<compile_context>
chip_gen: v6e
topology: v6e:2x2x1
jax: 0.10.0
libtpu: 0.0.40
codegen_flags: <defaults>
</compile_context>

<pallas_src>
import functools

import jax
import jax.numpy as jnp
from jax.experimental import pallas as pl
from jax.experimental.pallas import tpu as pltpu


def _kmax_kernel(x_ref, o_ref, *, k):
    """x_ref: (RB, S) rows-on-sublanes tile; o_ref: (k, RB) lane-dense output."""
    x = x_ref[...]
    if x.dtype not in (jnp.float32, jnp.bfloat16):
        x = x.astype(jnp.float32)

    # In-kernel transpose (XLU slot) -> (S, RB): sequence on sublanes, rows on
    # lanes, so every vector op uses all 128 lanes even when S << 128, and the
    # wrapper no longer pays a separate XLA transpose pass over HBM.
    xt = jnp.transpose(x, (1, 0))
    s, rb = xt.shape

    i_iota = jax.lax.broadcasted_iota(jnp.int32, (s, rb), 0)   # sequence index
    neg_inf = jnp.asarray(-jnp.inf, dtype=xt.dtype)
    sentinel = jnp.int32(s)

    # k iterative max-extractions: O(k*S) VPU work per lane element (vs O(S^2)
    # pairwise); the max/min reductions land on the otherwise-idle XLU slot.
    active = jnp.ones((s, rb), dtype=jnp.bool_)
    sel_idx = []            # k x (1, RB) int32 -- index of the p-th extraction
    sel_val = []            # k x (1, RB) f32   -- its value
    for _ in range(k):
        masked = jnp.where(active, xt, neg_inf)
        m = jnp.max(masked, axis=0, keepdims=True)                    # (1, RB)
        is_max = jnp.logical_and(active, masked == m)
        # earliest index among ties (matches stable top-k semantics)
        idx = jnp.min(jnp.where(is_max, i_iota, sentinel),
                      axis=0, keepdims=True)                          # (1, RB)
        active = jnp.logical_and(active, i_iota != idx)
        sel_idx.append(idx)
        sel_val.append(m.astype(jnp.float32))

    # Restore original sequence order. Selected indices are all distinct, so an
    # element's output slot is just the count of selected indices before it:
    # O(k^2) ops on (1, RB) vectors only (no tril matmul, no (S,k,RB) one-hot).
    slots = []
    for p in range(k):
        slot_p = jnp.zeros_like(sel_idx[p])
        for q in range(k):
            if q != p:
                slot_p = slot_p + (sel_idx[q] < sel_idx[p]).astype(jnp.int32)
        slots.append(slot_p)

    slot_iota = jax.lax.broadcasted_iota(jnp.int32, (k, rb), 0)
    out = jnp.zeros((k, rb), dtype=jnp.float32)
    for p in range(k):
        out = out + jnp.where(slot_iota == slots[p], sel_val[p], 0.0)
    o_ref[...] = out.astype(o_ref.dtype)


def _choose_rb(rows, s):
    """Row-block (lane) width; rows live on the lane axis inside the kernel."""
    # ~8 (s, rb)-sized f32/int32 temps are live per grid step; target a few MiB
    # so the ~0.35 us/step grid overhead is amortized; cap at 4096 lanes.
    target_bytes = 4 << 20
    rb = target_bytes // (4 * s * 8)
    rb = max(128, min(4096, (rb // 128) * 128))
    r_pad128 = -(-rows // 128) * 128
    rb = min(rb, r_pad128)
    # v7x has 2 TensorCores per chip: keep >= 2 parallel grid steps when the
    # row count allows, so both cores get row blocks (v5e/v6e are single-TC).
    if r_pad128 > 128 and r_pad128 // rb < 2:
        rb = max(128, ((r_pad128 // 2) // 128) * 128)
    return rb


def _vmem_limit_bytes(rb, s, k, itemsize):
    """Scoped-VMEM limit sized to the real footprint, capped per chip."""
    cap = 64 << 20                                   # v7x per-TC VMEM (smallest)
    try:
        cap = int(pltpu.get_tpu_info().vmem_capacity_bytes)
    except Exception:
        pass
    in_bufs = 2 * rb * s * itemsize                  # double-buffered input tile
    out_bufs = 2 * k * rb * itemsize                 # double-buffered output tile
    temps = 8 * 4 * s * rb + 16 * 4 * k * rb         # in-kernel live values
    need = in_bufs + out_bufs + temps + (8 << 20)    # + Mosaic internal scratch
    # Stay above the 16 MiB v5e scoped default, but leave >= ~3/8 of physical
    # VMEM for pipeline buffers / internal scratch (matters most on v7x).
    return int(min(max(need, 24 << 20), (cap * 5) // 8))


def k_max_pool(x, k=4):
    """x: (B, C, S) -> (B, C, k): k largest per (b, c) row, original order kept."""
    b, c, s = x.shape
    assert k <= s, "k must not exceed the sequence length"
    rows = b * c
    x2d = x.reshape(rows, s)

    rb = _choose_rb(rows, s)
    r_pad = -(-rows // rb) * rb
    if r_pad != rows:
        # Padded rows are independent lanes; their outputs are sliced off below.
        x2d = jnp.pad(x2d, ((0, r_pad - rows), (0, 0)))

    # TODO(synk): for very large S (>~8k) the per-step (S, rb=128) temps alone
    # exceed the VMEM cap; that regime needs an S-chunked two-pass (per-chunk
    # top-k then merge), not just a smaller row block.
    out_t = pl.pallas_call(
        functools.partial(_kmax_kernel, k=k),
        out_shape=jax.ShapeDtypeStruct((k, r_pad), x.dtype),
        grid_spec=pltpu.PrefetchScalarGridSpec(
            num_scalar_prefetch=0,
            grid=(r_pad // rb,),
            in_specs=[pl.BlockSpec((rb, s), lambda i: (i, 0))],
            out_specs=pl.BlockSpec((k, rb), lambda i: (0, i)),   # lane-dense out
        ),
        compiler_params=pltpu.CompilerParams(
            dimension_semantics=("parallel",),
            vmem_limit_bytes=_vmem_limit_bytes(rb, s, k, x.dtype.itemsize),
        ),
    )(x2d)

    return out_t[:, :rows].T.reshape(b, c, k)


def _reference(x, k):
    """Pure-JAX reference: top-k along last axis, kept in original order."""
    order = jnp.argsort(-x, axis=-1)[..., :k]     # stable: ties -> earlier index
    keep = jnp.sort(order, axis=-1)               # restore original sequence order
    return jnp.take_along_axis(x, keep, axis=-1)


if __name__ == "__main__":
    key = jax.random.PRNGKey(0)
    B, C, S, K = 2, 4, 16, 4                      # KMaxPool(k=4) on a (B, C, S) signal
    x = jax.random.normal(key, (B, C, S), dtype=jnp.float32)

    out = jax.block_until_ready(k_max_pool(x, k=K))

    ref = _reference(x, K)
    assert out.shape == (B, C, K), out.shape
    assert jnp.allclose(out, ref, atol=1e-6), "mismatch vs reference"

    print("KERNEL_OK")
</pallas_src>

<mosaic_0001>
module attributes {stable_mosaic.version = 11 : i64} {
  func.func @_kmax_kernel(%arg0: i32, %arg1: memref<128x16xf32, #tpu.memory_space<vmem>>, %arg2: memref<4x128xf32, #tpu.memory_space<vmem>>) attributes {dimension_semantics = [#tpu.dimension_semantics<parallel>], iteration_bounds = array<i64: 1>, scalar_prefetch = 0 : i64, scratch_operands = 0 : i64, tpu.core_type = #tpu.core_type<tc>, window_params = [{transform_indices = @transform_0, window_bounds = array<i64: 128, 16>}, {transform_indices = @transform_1, window_bounds = array<i64: 4, 128>}]} {
    %c0 = arith.constant 0 : index
    %c0_0 = arith.constant 0 : index
    %0 = vector.load %arg1[%c0, %c0_0] : memref<128x16xf32, #tpu.memory_space<vmem>>, vector<128x16xf32>
    %1 = tpu.transpose %0, [1, 0] : vector<128x16xf32> -> vector<16x128xf32>
    %2 = tpu.iota {dimensions = array<i32: 0>} : vector<16x128xi32>
    %true = arith.constant true
    %3 = vector.broadcast %true : i1 to vector<16x128xi1>
    %cst = arith.constant 0xFF800000 : f32
    %4 = vector.broadcast %cst : f32 to vector<16x128xf32>
    %5 = arith.select %3, %1, %4 : vector<16x128xi1>, vector<16x128xf32>
    %cst_1 = arith.constant dense<0xFF800000> : vector<128xf32>
    %6 = vector.multi_reduction <maximumf>, %5, %cst_1 [0] : vector<16x128xf32> to vector<128xf32>
    %7 = vector.shape_cast %6 : vector<128xf32> to vector<1x128xf32>
    %8 = vector.broadcast %7 : vector<1x128xf32> to vector<16x128xf32>
    %9 = arith.cmpf oeq, %5, %8 : vector<16x128xf32>
    %10 = arith.andi %3, %9 : vector<16x128xi1>
    %c16_i32 = arith.constant 16 : i32
    %11 = vector.broadcast %c16_i32 : i32 to vector<16x128xi32>
    %12 = arith.select %10, %2, %11 : vector<16x128xi1>, vector<16x128xi32>
    %cst_2 = arith.constant dense<2147483647> : vector<128xi32>
    %13 = vector.multi_reduction <minsi>, %12, %cst_2 [0] : vector<16x128xi32> to vector<128xi32>
    %14 = vector.shape_cast %13 : vector<128xi32> to vector<1x128xi32>
    %15 = vector.broadcast %14 : vector<1x128xi32> to vector<16x128xi32>
    %16 = arith.cmpi ne, %2, %15 : vector<16x128xi32>
    %17 = arith.andi %3, %16 : vector<16x128xi1>
    %cst_3 = arith.constant 0xFF800000 : f32
    %18 = vector.broadcast %cst_3 : f32 to vector<16x128xf32>
    %19 = arith.select %17, %1, %18 : vector<16x128xi1>, vector<16x128xf32>
    %cst_4 = arith.constant dense<0xFF800000> : vector<128xf32>
    %20 = vector.multi_reduction <maximumf>, %19, %cst_4 [0] : vector<16x128xf32> to vector<128xf32>
    %21 = vector.shape_cast %20 : vector<128xf32> to vector<1x128xf32>
    %22 = vector.broadcast %21 : vector<1x128xf32> to vector<16x128xf32>
    %23 = arith.cmpf oeq, %19, %22 : vector<16x128xf32>
    %24 = arith.andi %17, %23 : vector<16x128xi1>
    %c16_i32_5 = arith.constant 16 : i32
    %25 = vector.broadcast %c16_i32_5 : i32 to vector<16x128xi32>
    %26 = arith.select %24, %2, %25 : vector<16x128xi1>, vector<16x128xi32>
    %cst_6 = arith.constant dense<2147483647> : vector<128xi32>
    %27 = vector.multi_reduction <minsi>, %26, %cst_6 [0] : vector<16x128xi32> to vector<128xi32>
    %28 = vector.shape_cast %27 : vector<128xi32> to vector<1x128xi32>
    %29 = vector.broadcast %28 : vector<1x128xi32> to vector<16x128xi32>
    %30 = arith.cmpi ne, %2, %29 : vector<16x128xi32>
    %31 = arith.andi %17, %30 : vector<16x128xi1>
    %cst_7 = arith.constant 0xFF800000 : f32
    %32 = vector.broadcast %cst_7 : f32 to vector<16x128xf32>
    %33 = arith.select %31, %1, %32 : vector<16x128xi1>, vector<16x128xf32>
    %cst_8 = arith.constant dense<0xFF800000> : vector<128xf32>
    %34 = vector.multi_reduction <maximumf>, %33, %cst_8 [0] : vector<16x128xf32> to vector<128xf32>
    %35 = vector.shape_cast %34 : vector<128xf32> to vector<1x128xf32>
    %36 = vector.broadcast %35 : vector<1x128xf32> to vector<16x128xf32>
    %37 = arith.cmpf oeq, %33, %36 : vector<16x128xf32>
    %38 = arith.andi %31, %37 : vector<16x128xi1>
    %c16_i32_9 = arith.constant 16 : i32
    %39 = vector.broadcast %c16_i32_9 : i32 to vector<16x128xi32>
    %40 = arith.select %38, %2, %39 : vector<16x128xi1>, vector<16x128xi32>
    %cst_10 = arith.constant dense<2147483647> : vector<128xi32>
    %41 = vector.multi_reduction <minsi>, %40, %cst_10 [0] : vector<16x128xi32> to vector<128xi32>
    %42 = vector.shape_cast %41 : vector<128xi32> to vector<1x128xi32>
    %43 = vector.broadcast %42 : vector<1x128xi32> to vector<16x128xi32>
    %44 = arith.cmpi ne, %2, %43 : vector<16x128xi32>
    %45 = arith.andi %31, %44 : vector<16x128xi1>
    %cst_11 = arith.constant 0xFF800000 : f32
    %46 = vector.broadcast %cst_11 : f32 to vector<16x128xf32>
    %47 = arith.select %45, %1, %46 : vector<16x128xi1>, vector<16x128xf32>
    %cst_12 = arith.constant dense<0xFF800000> : vector<128xf32>
    %48 = vector.multi_reduction <maximumf>, %47, %cst_12 [0] : vector<16x128xf32> to vector<128xf32>
    %49 = vector.shape_cast %48 : vector<128xf32> to vector<1x128xf32>
    %50 = vector.broadcast %49 : vector<1x128xf32> to vector<16x128xf32>
    %51 = arith.cmpf oeq, %47, %50 : vector<16x128xf32>
    %52 = arith.andi %45, %51 : vector<16x128xi1>
    %c16_i32_13 = arith.constant 16 : i32
    %53 = vector.broadcast %c16_i32_13 : i32 to vector<16x128xi32>
    %54 = arith.select %52, %2, %53 : vector<16x128xi1>, vector<16x128xi32>
    %cst_14 = arith.constant dense<2147483647> : vector<128xi32>
    %55 = vector.multi_reduction <minsi>, %54, %cst_14 [0] : vector<16x128xi32> to vector<128xi32>
    %56 = vector.shape_cast %55 : vector<128xi32> to vector<1x128xi32>
    %c0_i32 = arith.constant 0 : i32
    %57 = vector.broadcast %c0_i32 : i32 to vector<1x128xi32>
    %58 = arith.cmpi slt, %28, %14 : vector<1x128xi32>
    %59 = arith.extui %58 : vector<1x128xi1> to vector<1x128xi32>
    %60 = arith.addi %57, %59 : vector<1x128xi32>
    %61 = arith.cmpi slt, %42, %14 : vector<1x128xi32>
    %62 = arith.extui %61 : vector<1x128xi1> to vector<1x128xi32>
    %63 = arith.addi %60, %62 : vector<1x128xi32>
    %64 = arith.cmpi slt, %56, %14 : vector<1x128xi32>
    %65 = arith.extui %64 : vector<1x128xi1> to vector<1x128xi32>
    %66 = arith.addi %63, %65 : vector<1x128xi32>
    %c0_i32_15 = arith.constant 0 : i32
    %67 = vector.broadcast %c0_i32_15 : i32 to vector<1x128xi32>
    %68 = arith.cmpi slt, %14, %28 : vector<1x128xi32>
    %69 = arith.extui %68 : vector<1x128xi1> to vector<1x128xi32>
    %70 = arith.addi %67, %69 : vector<1x128xi32>
    %71 = arith.cmpi slt, %42, %28 : vector<1x128xi32>
    %72 = arith.extui %71 : vector<1x128xi1> to vector<1x128xi32>
    %73 = arith.addi %70, %72 : vector<1x128xi32>
    %74 = arith.cmpi slt, %56, %28 : vector<1x128xi32>
    %75 = arith.extui %74 : vector<1x128xi1> to vector<1x128xi32>
    %76 = arith.addi %73, %75 : vector<1x128xi32>
    %c0_i32_16 = arith.constant 0 : i32
    %77 = vector.broadcast %c0_i32_16 : i32 to vector<1x128xi32>
    %78 = arith.cmpi slt, %14, %42 : vector<1x128xi32>
    %79 = arith.extui %78 : vector<1x128xi1> to vector<1x128xi32>
    %80 = arith.addi %77, %79 : vector<1x128xi32>
    %81 = arith.cmpi slt, %28, %42 : vector<1x128xi32>
    %82 = arith.extui %81 : vector<1x128xi1> to vector<1x128xi32>
    %83 = arith.addi %80, %82 : vector<1x128xi32>
    %84 = arith.cmpi slt, %56, %42 : vector<1x128xi32>
    %85 = arith.extui %84 : vector<1x128xi1> to vector<1x128xi32>
    %86 = arith.addi %83, %85 : vector<1x128xi32>
    %c0_i32_17 = arith.constant 0 : i32
    %87 = vector.broadcast %c0_i32_17 : i32 to vector<1x128xi32>
    %88 = arith.cmpi slt, %14, %56 : vector<1x128xi32>
    %89 = arith.extui %88 : vector<1x128xi1> to vector<1x128xi32>
    %90 = arith.addi %87, %89 : vector<1x128xi32>
    %91 = arith.cmpi slt, %28, %56 : vector<1x128xi32>
    %92 = arith.extui %91 : vector<1x128xi1> to vector<1x128xi32>
    %93 = arith.addi %90, %92 : vector<1x128xi32>
    %94 = arith.cmpi slt, %42, %56 : vector<1x128xi32>
    %95 = arith.extui %94 : vector<1x128xi1> to vector<1x128xi32>
    %96 = arith.addi %93, %95 : vector<1x128xi32>
    %97 = tpu.iota {dimensions = array<i32: 0>} : vector<4x128xi32>
    %cst_18 = arith.constant 0.000000e+00 : f32
    %98 = vector.broadcast %cst_18 : f32 to vector<4x128xf32>
    %99 = vector.broadcast %66 : vector<1x128xi32> to vector<4x128xi32>
    %100 = arith.cmpi eq, %97, %99 : vector<4x128xi32>
    %cst_19 = arith.constant 0.000000e+00 : f32
    %101 = vector.shape_cast %7 : vector<1x128xf32> to vector<1x128xf32>
    %102 = vector.broadcast %101 : vector<1x128xf32> to vector<4x128xf32>
    %103 = vector.broadcast %cst_19 : f32 to vector<4x128xf32>
    %104 = arith.select %100, %102, %103 : vector<4x128xi1>, vector<4x128xf32>
    %105 = arith.addf %98, %104 : vector<4x128xf32>
    %106 = vector.broadcast %76 : vector<1x128xi32> to vector<4x128xi32>
    %107 = arith.cmpi eq, %97, %106 : vector<4x128xi32>
    %cst_20 = arith.constant 0.000000e+00 : f32
    %108 = vector.shape_cast %21 : vector<1x128xf32> to vector<1x128xf32>
    %109 = vector.broadcast %108 : vector<1x128xf32> to vector<4x128xf32>
    %110 = vector.broadcast %cst_20 : f32 to vector<4x128xf32>
    %111 = arith.select %107, %109, %110 : vector<4x128xi1>, vector<4x128xf32>
    %112 = arith.addf %105, %111 : vector<4x128xf32>
    %113 = vector.broadcast %86 : vector<1x128xi32> to vector<4x128xi32>
    %114 = arith.cmpi eq, %97, %113 : vector<4x128xi32>
    %cst_21 = arith.constant 0.000000e+00 : f32
    %115 = vector.shape_cast %35 : vector<1x128xf32> to vector<1x128xf32>
    %116 = vector.broadcast %115 : vector<1x128xf32> to vector<4x128xf32>
    %117 = vector.broadcast %cst_21 : f32 to vector<4x128xf32>
    %118 = arith.select %114, %116, %117 : vector<4x128xi1>, vector<4x128xf32>
    %119 = arith.addf %112, %118 : vector<4x128xf32>
    %120 = vector.broadcast %96 : vector<1x128xi32> to vector<4x128xi32>
    %121 = arith.cmpi eq, %97, %120 : vector<4x128xi32>
    %cst_22 = arith.constant 0.000000e+00 : f32
    %122 = vector.shape_cast %49 : vector<1x128xf32> to vector<1x128xf32>
    %123 = vector.broadcast %122 : vector<1x128xf32> to vector<4x128xf32>
    %124 = vector.broadcast %cst_22 : f32 to vector<4x128xf32>
    %125 = arith.select %121, %123, %124 : vector<4x128xi1>, vector<4x128xf32>
    %126 = arith.addf %119, %125 : vector<4x128xf32>
    %c0_23 = arith.constant 0 : index
    %c0_24 = arith.constant 0 : index
    %127 = vector.load %arg2[%c0_23, %c0_24] : memref<4x128xf32, #tpu.memory_space<vmem>>, vector<4x128xf32>
    tpu.vector_store %arg2[%c0_23, %c0_24], %126 {strides = array<i32>} : memref<4x128xf32, #tpu.memory_space<vmem>>, vector<4x128xf32>,
    return
  }
  func.func @transform_0(%arg0: i32) -> (i32, i32) {
    %c0_i32 = arith.constant 0 : i32
    %c0_i32_0 = arith.constant 0 : i32
    return %arg0, %c0_i32 : i32, i32
  }
  func.func @transform_1(%arg0: i32) -> (i32, i32) {
    %c0_i32 = arith.constant 0 : i32
    %c0_i32_0 = arith.constant 0 : i32
    return %c0_i32, %arg0 : i32, i32
  }
}

</mosaic_0001>

<bundles_post_ra>
// kernel: tpu_custom_call.1
= control target key start
LH: loop header
LB: loop body
LE: loop exit
PB: predicated region body
PF: predicated region fallthrough
CT: control target
= control target key end

     0   :  { %s436_s0 = inlined_call_operand.vmem [shape: f32[128,16], index: 0, kind: input, shape index: {}]   ;;  %s437_s1 = inlined_call_operand.hbm [shape: f32[4,128], index: 1, kind: output, shape index: {}]  }
   0x1   :  { %v9_v0 = vld [vmem:[%s436_s0] sm:$0xff]  ;;  %v10_v1 = vld [vmem:[%s436_s0 + $0x8] sm:$0xff] }
   0x2   :  { %25 = vxpose.xlu0.b32.start [1/16] (narrow) %v9_v0, 16 }
   0x6   :  { %26 = vxpose.xlu0.b32.cont [2/16] (narrow) %v10_v1, 16 }
   0x7   :  { %6 = vsyncpa [#allocation3], 0  ;;  %v11_v2 = vld [vmem:[%s436_s0 + $0x10] sm:$0xff]  ;;  %v12_v3 = vld [vmem:[%s436_s0 + $0x18] sm:$0xff]  ;;  %v57_v20 = vlaneseq }
   0x8   :  { %v13_v4 = vld [vmem:[%s436_s0 + $0x20] sm:$0xff]  ;;  %v14_v5 = vld [vmem:[%s436_s0 + $0x28] sm:$0xff]  ;;  %v15_v6 = vld [vmem:[%s436_s0 + $0x30] sm:$0xff] }
   0x9   :  { %v16_v7 = vld [vmem:[%s436_s0 + $0x38] sm:$0xff]  ;;  %v17_v8 = vld [vmem:[%s436_s0 + $0x40] sm:$0xff]  ;;  %v18_v9 = vld [vmem:[%s436_s0 + $0x48] sm:$0xff]  ;;  %v319_v23 = vshrl.u32 %v57_v20, 7 }
   0xa   :  { %27 = vxpose.xlu0.b32.cont [3/16] (narrow) %v11_v2, 16  ;;  %v19_v10 = vld [vmem:[%s436_s0 + $0x50] sm:$0xff]  ;;  %v20_v11 = vld [vmem:[%s436_s0 + $0x58] sm:$0xff]  ;;  %v21_v12 = vld [vmem:[%s436_s0 + $0x60] sm:$0xff] }
   0xb   :  { %v22_v13 = vld [vmem:[%s436_s0 + $0x68] sm:$0xff]  ;;  %v23_v14 = vld [vmem:[%s436_s0 + $0x70] sm:$0xff]  ;;  %v24_v15 = vld [vmem:[%s436_s0 + $0x78] sm:$0xff]  ;;  %v322_v26 = vadd.s32 8, %v319_v23  ;;  %s254_s0 = smov [#allocation2]  }
   0xc   :  { %s221_s9 = sshll.u32 %s254_s0, 4  ;;  %s222_s9 = int_to_ptr.vmem [resolvable:$true] %s221_s9 }
   0xd   :  { %s231_s10 = scalar_lea.vmem %s222_s9, 64  ;;  %p236_p1 = scmp.lt.s32.totalorder %s222_s9, %s222_s9 }
   0xe   :  { %28 = vxpose.xlu0.b32.cont [4/16] (narrow) %v12_v3, 16  ;;  %p232_p0 = scmp.ne.s32.totalorder %s222_s9, %s231_s10  ;;  %p237_p2 = scmp.lt.s32.totalorder %s231_s10, %s231_s10 }
  0x10   :  { %p238_p3 = por %p237_p2, %p236_p1 }
  0x12   :  { %29 = vxpose.xlu0.b32.cont [5/16] (narrow) %v13_v4, 16  ;;  %p239_p4 = pnand %p238_p3, %p232_p0 }
  0x16   :  { %30 = vxpose.xlu0.b32.cont [6/16] (narrow) %v14_v5, 16 }
  0x1a   :  { %31 = vxpose.xlu0.b32.cont [7/16] (narrow) %v15_v6, 16 }
  0x1e   :  { %32 = vxpose.xlu0.b32.cont [8/16] (narrow) %v16_v7, 16 }
  0x22   :  { %33 = vxpose.xlu0.b32.cont [9/16] (narrow) %v17_v8, 16 }
  0x26   :  { %34 = vxpose.xlu0.b32.cont [10/16] (narrow) %v18_v9, 16 }
  0x2a   :  { %35 = vxpose.xlu0.b32.cont [11/16] (narrow) %v19_v10, 16 }
  0x2e   :  { %36 = vxpose.xlu0.b32.cont [12/16] (narrow) %v20_v11, 16 }
  0x32   :  { %37 = vxpose.xlu0.b32.cont [13/16] (narrow) %v21_v12, 16 }
  0x36   :  { %38 = vxpose.xlu0.b32.cont [14/16] (narrow) %v22_v13, 16 }
  0x3a   :  { %39 = vxpose.xlu0.b32.cont [15/16] (narrow) %v23_v14, 16 }
  0x3e   :  { %40 = vxpose.xlu0.b32.end [16/16] (narrow) %v24_v15, 16 }
  0x7e   :  { %v313_v16 = vpop.trf.xlu0 }
  0x82   :  { %v315_v17 = vpop.trf.xlu0 }
  0x83   :  { %v60_v18 = vmax.f32 %v313_v16, %v315_v17 }
  0x85   :  { %v61_v19 = vrot.slane %v60_v18, 4 }
  0x87   :  { %v62_v21 = vmax.f32 %v60_v18, %v61_v19 }
  0x89   :  { %v63_v22 = vrot.slane %v62_v21, 2 }
  0x8b   :  { %v64_v24 = vmax.f32 %v62_v21, %v63_v22 }
  0x8d   :  { %v65_v25 = vrot.slane %v64_v24, 1 }
  0x8f   :  { %v324_v27 = vmax.f32 %v64_v24, %v65_v25 }
  0x91   :  { %vm67_vm0 = vcmp.eq.f32.partialorder %v313_v16, %v324_v27  ;;  %vm68_vm1 = vcmp.eq.f32.partialorder %v315_v17, %v324_v27 }
  0x92   :  { %v69_v28 = vsel %vm67_vm0, %v319_v23, 16  ;;  %v70_v29 = vsel %vm68_vm1, %v322_v26, 16 }
  0x93   :  { %vm71_vm2 = vcmp.lt.s32.totalorder %v69_v28, %v70_v29 }
  0x94   :  { %v72_v30 = vsel %vm71_vm2, %v69_v28, %v70_v29  ;;  %v253_v29 = vmov 0  }
  0x95   :  { %v73_v31 = vrot.slane %v72_v30, 4 }
  0x97   :  { %vm74_vm3 = vcmp.lt.s32.totalorder %v72_v30, %v73_v31 }
  0x98   :  { %v75_v32 = vsel %vm74_vm3, %v72_v30, %v73_v31 }
  0x99   :  { %v76_v33 = vrot.slane %v75_v32, 2 }
  0x9b   :  { %vm77_vm4 = vcmp.lt.s32.totalorder %v75_v32, %v76_v33 }
  0x9c   :  { %v78_v34 = vsel %vm77_vm4, %v75_v32, %v76_v33 }
  0x9d   :  { %v79_v35 = vrot.slane %v78_v34, 1 }
  0x9f   :  { %vm80_vm5 = vcmp.lt.s32.totalorder %v78_v34, %v79_v35 }
  0xa0   :  { %v332_v36 = vsel %vm80_vm5, %v78_v34, %v79_v35 }
  0xa1   :  { %vm82_vm6 = vcmp.ne.s32.totalorder %v319_v23, %v332_v36  ;;  %vm83_vm7 = vcmp.ne.s32.totalorder %v322_v26, %v332_v36 }
  0xa2   :  { %v84_v37 = vsel %vm82_vm6, %v313_v16, -inf  ;;  %v85_v38 = vsel %vm83_vm7, %v315_v17, -inf }
  0xa3   :  { %v86_v39 = vmax.f32 %v84_v37, %v85_v38 }
  0xa5   :  { %v87_v40 = vrot.slane %v86_v39, 4 }
  0xa7   :  { %v88_v41 = vmax.f32 %v86_v39, %v87_v40 }
  0xa9   :  { %v89_v42 = vrot.slane %v88_v41, 2 }
  0xab   :  { %v90_v43 = vmax.f32 %v88_v41, %v89_v42 }
  0xad   :  { %v91_v44 = vrot.slane %v90_v43, 1 }
  0xaf   :  { %v346_v45 = vmax.f32 %v90_v43, %v91_v44 }
  0xb1   :  { %vm93_vm8 = vcmp.eq.f32.partialorder %v84_v37, %v346_v45  ;;  %vm94_vm9 = vcmp.eq.f32.partialorder %v85_v38, %v346_v45 }
  0xb2   :  { %vm95_vm10 = vmand %vm82_vm6, %vm93_vm8 }
  0xb3   :  { %vm96_vm11 = vmand %vm83_vm7, %vm94_vm9  ;;  %v97_v46 = vsel %vm95_vm10, %v319_v23, 16 }
  0xb4   :  { %v98_v47 = vsel %vm96_vm11, %v322_v26, 16 }
  0xb5   :  { %vm99_vm12 = vcmp.lt.s32.totalorder %v97_v46, %v98_v47 }
  0xb6   :  { %v100_v48 = vsel %vm99_vm12, %v97_v46, %v98_v47 }
  0xb7   :  { %v101_v49 = vrot.slane %v100_v48, 4 }
  0xb9   :  { %vm102_vm13 = vcmp.lt.s32.totalorder %v100_v48, %v101_v49 }
  0xba   :  { %v103_v50 = vsel %vm102_vm13, %v100_v48, %v101_v49 }
  0xbb   :  { %v104_v51 = vrot.slane %v103_v50, 2 }
  0xbd   :  { %vm105_vm14 = vcmp.lt.s32.totalorder %v103_v50, %v104_v51 }
  0xbe   :  { %v106_v52 = vsel %vm105_vm14, %v103_v50, %v104_v51 }
  0xbf   :  { %v107_v53 = vrot.slane %v106_v52, 1 }
  0xc1   :  { %vm108_vm15 = vcmp.lt.s32.totalorder %v106_v52, %v107_v53 }
  0xc2   :  { %v358_v54 = vsel %vm108_vm15, %v106_v52, %v107_v53 }
  0xc3   :  { %vm110_vm0 = vcmp.ne.s32.totalorder %v319_v23, %v358_v54  ;;  %vm111_vm1 = vcmp.ne.s32.totalorder %v322_v26, %v358_v54 }
  0xc4   :  { %vm367_vm2 = vmand %vm82_vm6, %vm110_vm0 }
  0xc5   :  { %vm374_vm3 = vmand %vm83_vm7, %vm111_vm1  ;;  %v114_v57 = vsel %vm367_vm2, %v313_v16, -inf }
  0xc6   :  { %v115_v58 = vsel %vm374_vm3, %v315_v17, -inf }
  0xc7   :  { %v116_v59 = vmax.f32 %v114_v57, %v115_v58 }
  0xc9   :  { %v117_v60 = vrot.slane %v116_v59, 4 }
  0xcb   :  { %v118_v61 = vmax.f32 %v116_v59, %v117_v60 }
  0xcd   :  { %v119_v62 = vrot.slane %v118_v61, 2 }
  0xcf   :  { %v120_v63 = vmax.f32 %v118_v61, %v119_v62 }
  0xd1   :  { %v121_v0 = vrot.slane %v120_v63, 1 }
  0xd3   :  { %v384_v1 = vmax.f32 %v120_v63, %v121_v0 }
  0xd5   :  { %vm123_vm4 = vcmp.eq.f32.partialorder %v114_v57, %v384_v1  ;;  %vm124_vm5 = vcmp.eq.f32.partialorder %v115_v58, %v384_v1 }
  0xd6   :  { %vm125_vm6 = vmand %vm367_vm2, %vm123_vm4 }
  0xd7   :  { %vm126_vm7 = vmand %vm374_vm3, %vm124_vm5  ;;  %v127_v2 = vsel %vm125_vm6, %v319_v23, 16 }
  0xd8   :  { %v128_v3 = vsel %vm126_vm7, %v322_v26, 16 }
  0xd9   :  { %vm129_vm8 = vcmp.lt.s32.totalorder %v127_v2, %v128_v3 }
  0xda   :  { %v130_v4 = vsel %vm129_vm8, %v127_v2, %v128_v3 }
  0xdb   :  { %v131_v5 = vrot.slane %v130_v4, 4 }
  0xdd   :  { %vm132_vm9 = vcmp.lt.s32.totalorder %v130_v4, %v131_v5 }
  0xde   :  { %v133_v6 = vsel %vm132_vm9, %v130_v4, %v131_v5 }
  0xdf   :  { %v134_v7 = vrot.slane %v133_v6, 2 }
  0xe1   :  { %vm135_vm10 = vcmp.lt.s32.totalorder %v133_v6, %v134_v7 }
  0xe2   :  { %v136_v8 = vsel %vm135_vm10, %v133_v6, %v134_v7 }
  0xe3   :  { %v137_v9 = vrot.slane %v136_v8, 1 }
  0xe5   :  { %vm138_vm11 = vcmp.lt.s32.totalorder %v136_v8, %v137_v9 }
  0xe6   :  { %v394_v10 = vsel %vm138_vm11, %v136_v8, %v137_v9  ;;  %vm170_vm11 = vcmp.lt.s32.totalorder %v358_v54, %v332_v36 }
  0xe7   :  { %vm140_vm12 = vcmp.ne.s32.totalorder %v319_v23, %v394_v10  ;;  %vm141_vm13 = vcmp.ne.s32.totalorder %v322_v26, %v394_v10  ;;  %vm172_vm6 = vcmp.lt.s32.totalorder %v394_v10, %v332_v36  ;;  %vm180_vm7 = vcmp.lt.s32.totalorder %v394_v10, %v358_v54 }
  0xe8   :  { %vm142_vm14 = vmand %vm367_vm2, %vm140_vm12  ;;  %vm186_vm8 = vcmp.lt.s32.totalorder %v332_v36, %v394_v10  ;;  %vm188_vm9 = vcmp.lt.s32.totalorder %v358_v54, %v394_v10  ;;  %v173_v30 = vsel %vm172_vm6, 1, %v253_v29  ;;  %vm178_vm12 = vcmp.lt.s32.totalorder %v332_v36, %v358_v54 }
  0xe9   :  { %vm143_vm15 = vmand %vm374_vm3, %vm141_vm13  ;;  %v144_v11 = vsel %vm142_vm14, %v313_v16, -inf  ;;  %v181_v32 = vsel %vm180_vm7, 1, %v253_v29  ;;  %v187_v33 = vsel %vm186_vm8, 1, %v253_v29  ;;  %v189_v34 = vsel %vm188_vm9, 1, %v253_v29 }
  0xea   :  { %v145_v12 = vsel %vm143_vm15, %v315_v17, -inf  ;;  %v171_v35 = vsel %vm170_vm11, 1, %v253_v29  ;;  %v179_v37 = vsel %vm178_vm12, 1, %v253_v29  ;;  %v190_v41 = vadd.s32 %v189_v34, %v187_v33 }
  0xeb   :  { %v146_v13 = vmax.f32 %v144_v11, %v145_v12  ;;  %v174_v39 = vadd.s32 %v173_v30, %v171_v35  ;;  %v182_v40 = vadd.s32 %v181_v32, %v179_v37 }
  0xed   :  { %v147_v14 = vrot.slane %v146_v13, 4 }
  0xef   :  { %v148_v15 = vmax.f32 %v146_v13, %v147_v14 }
  0xf1   :  { %v149_v18 = vrot.slane %v148_v15, 2 }
  0xf3   :  { %v150_v19 = vmax.f32 %v148_v15, %v149_v18 }
  0xf5   :  { %v151_v20 = vrot.slane %v150_v19, 1 }
  0xf7   :  { %v152_v21 = vmax.f32 %v150_v19, %v151_v20 }
  0xf9   :  { %vm153_vm0 = vcmp.eq.f32.partialorder %v144_v11, %v152_v21  ;;  %vm154_vm1 = vcmp.eq.f32.partialorder %v145_v12, %v152_v21 }
  0xfa   :  { %vm155_vm4 = vmand %vm142_vm14, %vm153_vm0 }
  0xfb   :  { %vm156_vm5 = vmand %vm143_vm15, %vm154_vm1  ;;  %v157_v22 = vsel %vm155_vm4, %v319_v23, 16 }
  0xfc   :  { %v158_v24 = vsel %vm156_vm5, %v322_v26, 16 }
  0xfd   :  { %vm159_vm2 = vcmp.lt.s32.totalorder %v157_v22, %v158_v24 }
  0xfe   :  { %v160_v25 = vsel %vm159_vm2, %v157_v22, %v158_v24 }
  0xff   :  { %v161_v16 = vrot.slane %v160_v25, 4 }
 0x101   :  { %vm162_vm3 = vcmp.lt.s32.totalorder %v160_v25, %v161_v16 }
 0x102   :  { %v163_v17 = vsel %vm162_vm3, %v160_v25, %v161_v16 }
 0x103   :  { %v164_v28 = vrot.slane %v163_v17, 2 }
 0x105   :  { %vm165_vm10 = vcmp.lt.s32.totalorder %v163_v17, %v164_v28 }
 0x106   :  { %v166_v26 = vsel %vm165_vm10, %v163_v17, %v164_v28 }
 0x107   :  { %v167_v31 = vrot.slane %v166_v26, 1 }
 0x109   :  { %vm168_vm13 = vcmp.lt.s32.totalorder %v166_v26, %v167_v31 }
 0x10a   :  { %v169_v38 = vsel %vm168_vm13, %v166_v26, %v167_v31 }
 0x10b   :  { %vm175_vm14 = vcmp.lt.s32.totalorder %v169_v38, %v332_v36  ;;  %vm183_vm15 = vcmp.lt.s32.totalorder %v169_v38, %v358_v54  ;;  %vm191_vm0 = vcmp.lt.s32.totalorder %v169_v38, %v394_v10  ;;  %vm194_vm1 = vcmp.lt.s32.totalorder %v332_v36, %v169_v38 }
 0x10c   :  { %v176_v42 = vsel %vm175_vm14, 1, %v253_v29  ;;  %v184_v43 = vsel %vm183_vm15, 1, %v253_v29  ;;  %v192_v44 = vsel %vm191_vm0, 1, %v253_v29  ;;  %v195_v46 = vsel %vm194_vm1, 1, %v253_v29 }
 0x10d   :  { %v177_v47 = vadd.s32 %v176_v42, %v174_v39  ;;  %v185_v48 = vadd.s32 %v184_v43, %v182_v40  ;;  %v193_v49 = vadd.s32 %v192_v44, %v190_v41  ;;  %vm196_vm4 = vcmp.lt.s32.totalorder %v358_v54, %v169_v38 }
 0x10e   :  { %v197_v50 = vsel %vm196_vm4, 1, %v253_v29  ;;  %vm199_vm5 = vcmp.lt.s32.totalorder %v394_v10, %v169_v38 }
 0x10f   :  { %v198_v51 = vadd.s32 %v197_v50, %v195_v46  ;;  %vm202_vm2 = vcmp.eq.s32.totalorder %v319_v23, %v177_v47  ;;  %vm205_vm3 = vcmp.eq.s32.totalorder %v319_v23, %v185_v48  ;;  %v200_v52 = vsel %vm199_vm5, 1, %v253_v29 }
 0x110   :  { %v203_v36 = vsel %vm202_vm2, %v324_v27, 0.0  ;;  %v206_v53 = vsel %vm205_vm3, %v346_v45, 0.0  ;;  %vm208_vm6 = vcmp.eq.s32.totalorder %v319_v23, %v193_v49 }
 0x111   :  { %v201_v55 = vadd.s32 %v200_v52, %v198_v51  ;;  %v207_v56 = vadd.f32 %v206_v53, %v203_v36  ;;  %v209_v57 = vsel %vm208_vm6, %v384_v1, 0.0 }
 0x113   :  { %v210_v54 = vadd.f32 %v209_v57, %v207_v56  ;;  %vm211_vm7 = vcmp.eq.s32.totalorder %v319_v23, %v201_v55 }
 0x114   :  { %v212_v58 = vsel %vm211_vm7, %v152_v21, 0.0 }
 0x115   :  { %v213_v59 = vadd.f32 %v212_v58, %v210_v54 }
 0x117   :  { %214 = vst [vmem:[#allocation2] sm:$0xf] %v213_v59 }
 0x118   :  { %242 = shalt.err (!%p239_p4)
}
 0x119   :  { %224 = dma.vmem_to_hbm [thread:$0]  %s222_s9, 64, %s437_s1, [#allocation3]  }
 0x11a   :  { %251 = dma.done.wait [#allocation3], 64  }
 0x11b   :  { %252 = vsyncadd [#allocation3], 4294967232 }
 0x11c   :  { %228 = vsyncpa [#allocation3], 1 }

</bundles_post_ra>
